<compile_context>
chip_gen: v7x
topology: tpu7x:2x2x1
jax: 0.10.0
libtpu: 0.0.40
codegen_flags: <defaults>
</compile_context>

<pallas_src>
import functools
import math

import numpy as np
import jax
import jax.numpy as jnp
from jax.experimental import pallas as pl
from jax.experimental.pallas import tpu as pltpu

LANE = 128


# ------------------------- host-side slab packing --------------------------- #
def _np(x):
    return np.asarray(x, np.float32)


def _block_diag_np(a, b):
    a, b = _np(a), _np(b)
    out = np.zeros((a.shape[0] + b.shape[0], a.shape[1] + b.shape[1]), np.float32)
    out[:a.shape[0], :a.shape[1]] = a
    out[a.shape[0]:, a.shape[1]:] = b
    return out


def pack_slab(feats, a_hat, ppmi, tao_1_L, tao_2_L, tao_1_G, tao_2_G, params):
    """Build the single lane-padded f32 slab ONCE (host/numpy, not per call)."""
    feats, a_hat, ppmi = _np(feats), _np(a_hat), _np(ppmi)
    t1l, t2l, t1g, t2g = map(_np, (tao_1_L, tao_2_L, tao_1_G, tao_2_G))
    p = {k: _np(v) for k, v in params.items()}

    n, d0 = feats.shape
    d1 = p["W0_L"].shape[1]
    d2 = p["W1_L"].shape[1]
    d3 = p["W_c"].shape[1]
    assert n % 8 == 0, "demo path assumes node count is a multiple of 8"
    assert 2 * n <= LANE and 2 * max(d0, d1, d2) <= LANE and d3 <= LANE

    # Call-invariant fusions folded into the cached slab.
    w0eff = _block_diag_np(p["W0_L"] @ t1l, p["W0_G"] @ t1g)   # W0 @ tao_1 (both branches)
    w1eff = _block_diag_np(p["W1_L"] @ t2l, p["W1_G"] @ t2g)   # W1 @ tao_2
    wa = p["W_a"][:, 0:1] - p["W_a"][:, 1:2]                   # 2-class softmax -> sigmoid
    wc2 = np.vstack([p["W_c"], p["W_c"]])                      # lets kernel skip the lane-offset H_G slice
    b0 = _block_diag_np(p["b0_L"].reshape(1, d1), p["b0_G"].reshape(1, d1))  # [2, 2*d1]
    b1 = _block_diag_np(p["b1_L"].reshape(1, d2), p["b1_G"].reshape(1, d2))  # [2, 2*d2]

    pieces = [
        ("feats", _block_diag_np(feats, feats), 2 * n),   # [2n, 2*d0]   LHS, full-lane
        ("prop",  _block_diag_np(a_hat, ppmi),  2 * n),   # [2n, 2n]     propagation
        ("w0eff", w0eff, LANE),                           # RHS padded to 128 rows
        ("w1eff", w1eff, LANE),
        ("wa",    wa,    LANE),
        ("wc2",   wc2,   LANE),
        ("b0",    b0,    8),
        ("b1",    b1,    8),
        ("bc",    p["b_c"].reshape(1, d3), 8),
    ]

    offs, chunks, r = {}, [], 0
    for name, arr, rows in pieces:
        pad = np.zeros((rows, LANE), np.float32)
        pad[:arr.shape[0], :arr.shape[1]] = arr
        offs[name] = r
        r += rows
        chunks.append(pad)
    slab = jnp.asarray(np.concatenate(chunks, axis=0))    # [600, 128] f32 ≈ 300 KiB
    meta = dict(n=n, d0=d0, d1=d1, d2=d2, d3=d3, offs=offs, rows=r)
    return slab, meta


# ----------------------------- Pallas kernel ------------------------------- #
def _meta_learner_kernel(slab_ref, y_ref, *, n, offs):
    f32 = jnp.float32
    dot = functools.partial(jnp.dot, preferred_element_type=f32)
    n2 = 2 * n

    def piece(name, rows):
        r0 = offs[name]                         # static Python int -> static window load
        return slab_ref[r0:r0 + rows, :]        # full 128 lanes, loaded only when needed

    # Block-diagonal bias rebuilt in-kernel (keeps off-diagonal blocks exactly 0).
    row_lt_n = jax.lax.broadcasted_iota(jnp.int32, (n2, LANE), 0) < n

    # ---- Layer 0 (L and G branches fused as block-diagonal operands) ----
    h = dot(piece("feats", n2), piece("w0eff", LANE))           # [2n, 128]
    prop = piece("prop", n2)[:, :n2]                            # leading-lane slice, no rotate
    b0 = piece("b0", 8)
    h = dot(prop, h) + jnp.where(row_lt_n, b0[0:1, :], b0[1:2, :])
    h = jnp.maximum(h, 0.0)                                     # activation[0] = relu (keeps 0s)

    # ---- Layer 1 ----
    h = dot(h, piece("w1eff", LANE))
    b1 = piece("b1", 8)
    h = dot(prop, h) + jnp.where(row_lt_n, b1[0:1, :], b1[1:2, :])   # activation[1] = None
    # h == block_diag(H_L, H_G) embedded in [2n, 128]

    # ---- Attention: 2-way softmax == sigmoid of the logit difference ----
    h_cat = h[:n, :] + h[n:, :]                                 # == concat([H_L, H_G], 1)
    logits = dot(h_cat, piece("wa", LANE))
    a = jax.nn.sigmoid(logits[:, 0:1])                          # softmax(...)[:, 0:1]

    # ---- Classifier fused through W_c (avoids the lane-offset H_G slice) ----
    hy = dot(h, piece("wc2", LANE))                             # [:n]=H_L@W_c, [n:]=H_G@W_c
    bc = piece("bc", 8)[0:1, :]
    y_ref[...] = a * hy[:n, :] + (1.0 - a) * hy[n:, :] + bc


# ------------------------------- wrapper ------------------------------------ #
def make_forward(meta):
    """Build the jitted per-call path once; per call it is a single pallas_call."""
    n, d3, offs, rows = meta["n"], meta["d3"], meta["offs"], meta["rows"]
    n2 = 2 * n
    kernel = functools.partial(_meta_learner_kernel, n=n, offs=offs)

    flops = 2 * (n2 * LANE * LANE       # layer-0 feature matmul
                 + n2 * n2 * LANE       # layer-0 propagation
                 + n2 * LANE * LANE     # layer-1 feature matmul
                 + n2 * n2 * LANE       # layer-1 propagation
                 + n * LANE * LANE      # attention logits
                 + n2 * LANE * LANE)    # fused z @ W_c
    bytes_accessed = (rows * LANE + n * LANE) * 4

    vmem = pl.BlockSpec(memory_space=pltpu.MemorySpace.VMEM)
    # TODO(synk): for large graphs the dense block-diag propagation matrix must be
    # un-fused and row-tiled from HBM (memory_space=pl.ANY + grid + vmem_limit_bytes);
    # v7x (64 MiB VMEM) hits the crossover at roughly half the graph size of v6e.
    # TODO(synk): for batched evaluation add a leading batch grid axis with
    # dimension_semantics=("parallel",) to use both v7x TensorCores.
    call = pl.pallas_call(
        kernel,
        out_shape=jax.ShapeDtypeStruct((n, LANE), jnp.float32),
        in_specs=[vmem],
        out_specs=vmem,
        cost_estimate=pl.CostEstimate(flops=flops, transcendentals=n,
                                      bytes_accessed=bytes_accessed),
    )

    @jax.jit
    def forward(slab):
        return call(slab)[:, :d3]       # lane-dense store in-kernel, tiny slice here

    return forward


def meta_learner_forward(feats, a_hat, ppmi,
                         tao_1_L, tao_2_L, tao_1_G, tao_2_G, params):
    """Convenience one-shot path: pack (once) + run."""
    slab, meta = pack_slab(feats, a_hat, ppmi,
                           tao_1_L, tao_2_L, tao_1_G, tao_2_G, params)
    return make_forward(meta)(slab)


# --------------------------- pure-JAX reference ----------------------------- #
def reference_forward(feats, a_hat, ppmi,
                      tao_1_L, tao_2_L, tao_1_G, tao_2_G, p):
    def bi_gcn(prop, t1, t2, w0, b0, w1, b1):
        h = feats @ (w0 @ t1)
        h = prop @ h + b0
        h = jnp.maximum(h, 0.0)
        h = h @ (w1 @ t2)
        h = prop @ h + b1
        return h

    h_l = bi_gcn(a_hat, tao_1_L, tao_2_L, p["W0_L"], p["b0_L"], p["W1_L"], p["b1_L"])
    h_g = bi_gcn(ppmi, tao_1_G, tao_2_G, p["W0_G"], p["b0_G"], p["W1_G"], p["b1_G"])
    attn = jax.nn.softmax(jnp.concatenate([h_l, h_g], axis=1) @ p["W_a"], axis=1)
    z = attn[:, 0:1] * h_l + attn[:, 1:2] * h_g
    return z @ p["W_c"] + p["b_c"]


# ---------------------------------- main ------------------------------------ #
if __name__ == "__main__":
    key = jax.random.PRNGKey(0)
    N = 16                      # number of graph nodes
    n_GCN = [16, 32, 32, 8]     # [d0, d1, d2, d3]
    d0, d1, d2, d3 = n_GCN

    def uniform(k, shape, stdv):
        return jax.random.uniform(k, shape, jnp.float32, -stdv, stdv)

    keys = jax.random.split(key, 32)
    ki = iter(keys)

    # Parameters (shapes/stdv mirror reset_parameters in the torch module).
    params = {}
    for branch in ("L", "G"):
        for i in range(2):
            w_stdv = 1.0 / math.sqrt(n_GCN[i + 1])
            b_stdv = 1.0 / math.sqrt(n_GCN[i])
            params[f"W{i}_{branch}"] = uniform(next(ki), (n_GCN[i], n_GCN[i + 1]), w_stdv)
            params[f"b{i}_{branch}"] = uniform(next(ki), (1, n_GCN[i + 1]), b_stdv)
    params["W_a"] = uniform(next(ki), (2 * d2, 2), 1.0 / math.sqrt(2.0))
    params["W_c"] = uniform(next(ki), (d2, d3), 1.0 / math.sqrt(d3))
    params["b_c"] = uniform(next(ki), (1, d3), 1.0 / math.sqrt(d3))

    # Inputs.
    feats = jax.random.normal(next(ki), (N, d0), jnp.float32)
    tao_1_L = jax.random.normal(next(ki), (d1, d1), jnp.float32) * 0.1 + jnp.eye(d1)
    tao_2_L = jax.random.normal(next(ki), (d2, d2), jnp.float32) * 0.1 + jnp.eye(d2)
    tao_1_G = jax.random.normal(next(ki), (d1, d1), jnp.float32) * 0.1 + jnp.eye(d1)
    tao_2_G = jax.random.normal(next(ki), (d2, d2), jnp.float32) * 0.1 + jnp.eye(d2)

    # Deterministic random symmetric graph with self-loops ->
    # A_hat = D^{-1/2} A D^{-1/2}  (exactly what gcn_msg/gcn_reduce compute).
    rand_adj = jax.random.uniform(next(ki), (N, N), jnp.float32)
    adj = ((rand_adj + rand_adj.T) * 0.5 > 0.6).astype(jnp.float32)
    adj = jnp.maximum(adj, jnp.eye(N, dtype=jnp.float32))
    deg = jnp.sum(adj, axis=1)
    norm = 1.0 / jnp.sqrt(deg)
    a_hat = norm[:, None] * adj * norm[None, :]

    # Dense PPMI matrix (synthetic, non-negative).
    ppmi = jnp.abs(jax.random.normal(next(ki), (N, N), jnp.float32)) * 0.1

    # Pack once (call-invariant); per-call path is a single pallas_call.
    slab, meta = pack_slab(feats, a_hat, ppmi,
                           tao_1_L, tao_2_L, tao_1_G, tao_2_G, params)
    forward = make_forward(meta)

    y = jax.block_until_ready(forward(slab))

    y_ref = reference_forward(feats, a_hat, ppmi,
                              tao_1_L, tao_2_L, tao_1_G, tao_2_G, params)
    assert y.shape == (N, d3)
    assert jnp.allclose(y, y_ref, atol=1e-4, rtol=1e-4), "mismatch vs reference"

    print("KERNEL_OK")
</pallas_src>

<mosaic_0001>
module attributes {stable_mosaic.version = 11 : i64} {
  func.func @_meta_learner_kernel(%arg0: memref<600x128xf32, #tpu.memory_space<vmem>>, %arg1: memref<16x128xf32, #tpu.memory_space<vmem>>) attributes {dimension_semantics = [], scalar_prefetch = 0 : i64, scratch_operands = 0 : i64, tpu.core_type = #tpu.core_type<tc>} {
    %0 = tpu.iota {dimensions = array<i32: 0>} : vector<32x128xi32>
    %c16_i32 = arith.constant 16 : i32
    %1 = vector.broadcast %c16_i32 : i32 to vector<32x128xi32>
    %2 = arith.cmpi slt, %0, %1 : vector<32x128xi32>
    %c0 = arith.constant 0 : index
    %c0_0 = arith.constant 0 : index
    %3 = vector.load %arg0[%c0, %c0_0] : memref<600x128xf32, #tpu.memory_space<vmem>>, vector<32x128xf32>
    %c64 = arith.constant 64 : index
    %c0_1 = arith.constant 0 : index
    %4 = vector.load %arg0[%c64, %c0_1] : memref<600x128xf32, #tpu.memory_space<vmem>>, vector<128x128xf32>
    %cst = arith.constant dense<0.000000e+00> : vector<32x128xf32>
    %5 = tpu.matmul %3, %4, %cst {dimension_numbers = #tpu.dot_dimension_numbers<[1], [0], [0], [1], [0, 0, 1, 1], [], []>} : vector<32x128xf32>, vector<128x128xf32>, vector<32x128xf32> -> vector<32x128xf32>
    %c32 = arith.constant 32 : index
    %c0_2 = arith.constant 0 : index
    %6 = vector.load %arg0[%c32, %c0_2] : memref<600x128xf32, #tpu.memory_space<vmem>>, vector<32x128xf32>
    %7 = vector.extract_strided_slice %6 {offsets = [0, 0], sizes = [32, 32], strides = [1, 1]} : vector<32x128xf32> to vector<32x32xf32>
    %c576 = arith.constant 576 : index
    %c0_3 = arith.constant 0 : index
    %8 = vector.load %arg0[%c576, %c0_3] : memref<600x128xf32, #tpu.memory_space<vmem>>, vector<8x128xf32>
    %cst_4 = arith.constant dense<0.000000e+00> : vector<32x128xf32>
    %9 = tpu.matmul %7, %5, %cst_4 {dimension_numbers = #tpu.dot_dimension_numbers<[1], [0], [0], [1], [0, 0, 1, 1], [], []>} : vector<32x32xf32>, vector<32x128xf32>, vector<32x128xf32> -> vector<32x128xf32>
    %10 = vector.extract_strided_slice %8 {offsets = [0, 0], sizes = [1, 128], strides = [1, 1]} : vector<8x128xf32> to vector<1x128xf32>
    %11 = vector.extract_strided_slice %8 {offsets = [1, 0], sizes = [1, 128], strides = [1, 1]} : vector<8x128xf32> to vector<1x128xf32>
    %12 = vector.shape_cast %10 : vector<1x128xf32> to vector<1x128xf32>
    %13 = vector.broadcast %12 : vector<1x128xf32> to vector<32x128xf32>
    %14 = vector.shape_cast %11 : vector<1x128xf32> to vector<1x128xf32>
    %15 = vector.broadcast %14 : vector<1x128xf32> to vector<32x128xf32>
    %16 = arith.select %2, %13, %15 : vector<32x128xi1>, vector<32x128xf32>
    %17 = arith.addf %9, %16 : vector<32x128xf32>
    %cst_5 = arith.constant 0.000000e+00 : f32
    %18 = vector.broadcast %cst_5 : f32 to vector<32x128xf32>
    %19 = arith.maximumf %17, %18 : vector<32x128xf32>
    %c192 = arith.constant 192 : index
    %c0_6 = arith.constant 0 : index
    %20 = vector.load %arg0[%c192, %c0_6] : memref<600x128xf32, #tpu.memory_space<vmem>>, vector<128x128xf32>
    %cst_7 = arith.constant dense<0.000000e+00> : vector<32x128xf32>
    %21 = tpu.matmul %19, %20, %cst_7 {dimension_numbers = #tpu.dot_dimension_numbers<[1], [0], [0], [1], [0, 0, 1, 1], [], []>} : vector<32x128xf32>, vector<128x128xf32>, vector<32x128xf32> -> vector<32x128xf32>
    %c584 = arith.constant 584 : index
    %c0_8 = arith.constant 0 : index
    %22 = vector.load %arg0[%c584, %c0_8] : memref<600x128xf32, #tpu.memory_space<vmem>>, vector<8x128xf32>
    %cst_9 = arith.constant dense<0.000000e+00> : vector<32x128xf32>
    %23 = tpu.matmul %7, %21, %cst_9 {dimension_numbers = #tpu.dot_dimension_numbers<[1], [0], [0], [1], [0, 0, 1, 1], [], []>} : vector<32x32xf32>, vector<32x128xf32>, vector<32x128xf32> -> vector<32x128xf32>
    %24 = vector.extract_strided_slice %22 {offsets = [0, 0], sizes = [1, 128], strides = [1, 1]} : vector<8x128xf32> to vector<1x128xf32>
    %25 = vector.extract_strided_slice %22 {offsets = [1, 0], sizes = [1, 128], strides = [1, 1]} : vector<8x128xf32> to vector<1x128xf32>
    %26 = vector.shape_cast %24 : vector<1x128xf32> to vector<1x128xf32>
    %27 = vector.broadcast %26 : vector<1x128xf32> to vector<32x128xf32>
    %28 = vector.shape_cast %25 : vector<1x128xf32> to vector<1x128xf32>
    %29 = vector.broadcast %28 : vector<1x128xf32> to vector<32x128xf32>
    %30 = arith.select %2, %27, %29 : vector<32x128xi1>, vector<32x128xf32>
    %31 = arith.addf %23, %30 : vector<32x128xf32>
    %32 = vector.extract_strided_slice %31 {offsets = [0, 0], sizes = [16, 128], strides = [1, 1]} : vector<32x128xf32> to vector<16x128xf32>
    %33 = vector.extract_strided_slice %31 {offsets = [16, 0], sizes = [16, 128], strides = [1, 1]} : vector<32x128xf32> to vector<16x128xf32>
    %34 = arith.addf %32, %33 : vector<16x128xf32>
    %c320 = arith.constant 320 : index
    %c0_10 = arith.constant 0 : index
    %35 = vector.load %arg0[%c320, %c0_10] : memref<600x128xf32, #tpu.memory_space<vmem>>, vector<128x128xf32>
    %cst_11 = arith.constant dense<0.000000e+00> : vector<16x128xf32>
    %36 = tpu.matmul %34, %35, %cst_11 {dimension_numbers = #tpu.dot_dimension_numbers<[1], [0], [0], [1], [0, 0, 1, 1], [], []>} : vector<16x128xf32>, vector<128x128xf32>, vector<16x128xf32> -> vector<16x128xf32>
    %37 = vector.extract_strided_slice %36 {offsets = [0, 0], sizes = [16, 1], strides = [1, 1]} : vector<16x128xf32> to vector<16x1xf32>
    %38 = arith.negf %37 : vector<16x1xf32>
    %39 = math.exp %38 : vector<16x1xf32>
    %cst_12 = arith.constant 1.000000e+00 : f32
    %40 = vector.broadcast %cst_12 : f32 to vector<16x1xf32>
    %41 = arith.addf %40, %39 : vector<16x1xf32>
    %42 = arith.divf %40, %41 : vector<16x1xf32>
    %c448 = arith.constant 448 : index
    %c0_13 = arith.constant 0 : index
    %43 = vector.load %arg0[%c448, %c0_13] : memref<600x128xf32, #tpu.memory_space<vmem>>, vector<128x128xf32>
    %cst_14 = arith.constant dense<0.000000e+00> : vector<32x128xf32>
    %44 = tpu.matmul %31, %43, %cst_14 {dimension_numbers = #tpu.dot_dimension_numbers<[1], [0], [0], [1], [0, 0, 1, 1], [], []>} : vector<32x128xf32>, vector<128x128xf32>, vector<32x128xf32> -> vector<32x128xf32>
    %c592 = arith.constant 592 : index
    %c0_15 = arith.constant 0 : index
    %45 = vector.load %arg0[%c592, %c0_15] : memref<600x128xf32, #tpu.memory_space<vmem>>, vector<8x128xf32>
    %46 = vector.extract_strided_slice %45 {offsets = [0, 0], sizes = [1, 128], strides = [1, 1]} : vector<8x128xf32> to vector<1x128xf32>
    %47 = vector.extract_strided_slice %44 {offsets = [0, 0], sizes = [16, 128], strides = [1, 1]} : vector<32x128xf32> to vector<16x128xf32>
    %48 = vector.broadcast %42 : vector<16x1xf32> to vector<16x128xf32>
    %49 = arith.mulf %48, %47 : vector<16x128xf32>
    %cst_16 = arith.constant 1.000000e+00 : f32
    %50 = vector.broadcast %cst_16 : f32 to vector<16x1xf32>
    %51 = arith.subf %50, %42 : vector<16x1xf32>
    %52 = vector.extract_strided_slice %44 {offsets = [16, 0], sizes = [16, 128], strides = [1, 1]} : vector<32x128xf32> to vector<16x128xf32>
    %53 = vector.broadcast %51 : vector<16x1xf32> to vector<16x128xf32>
    %54 = arith.mulf %53, %52 : vector<16x128xf32>
    %55 = arith.addf %49, %54 : vector<16x128xf32>
    %56 = vector.broadcast %46 : vector<1x128xf32> to vector<16x128xf32>
    %57 = arith.addf %55, %56 : vector<16x128xf32>
    %c0_17 = arith.constant 0 : index
    %c0_18 = arith.constant 0 : index
    %58 = vector.load %arg1[%c0_17, %c0_18] : memref<16x128xf32, #tpu.memory_space<vmem>>, vector<16x128xf32>
    tpu.vector_store %arg1[%c0_17, %c0_18], %57 {strides = array<i32>} : memref<16x128xf32, #tpu.memory_space<vmem>>, vector<16x128xf32>,
    return
  }
}

</mosaic_0001>

<bundles_post_ra>
// kernel: forward.1
= control target key start
LH: loop header
LB: loop body
LE: loop exit
PB: predicated region body
PF: predicated region fallthrough
CT: control target
= control target key end

     0   :  { %6 = vsyncpa [#allocation3], 0  ;;  %s1165_s6 = smov [#allocation2]   ;;  %s1230_s0 = inlined_call_operand.hbm [shape: f32[600,128], index: 0, kind: input, shape index: {}]   ;;  %s1231_s1 = inlined_call_operand.vmem [shape: f32[16,128], index: 1, kind: output, shape index: {}]  }
   0x1   :  { %s12_s7 = sshll.u32 %s1165_s6, 4  ;;  %s1141_s10 = scalar_lea.hbm %s1230_s0, 9600  ;;  %s13_s7 = int_to_ptr.vmem [resolvable:$true] %s12_s7 }
   0x2   :  { %p1142_p0 = scmp.ne.s32.totalorder %s1230_s0, %s1141_s10  ;;  %p1145_p1 = scmp.lt.u32.totalorder %s1141_s10, %s1230_s0 }
   0x4   :  { %p1147_p2 = pnand %p1145_p1, %p1142_p0 }
   0x6   :  { %1150 = shalt.err (!%p1147_p2)
}
   0x7   :  { %s1151_s15 = scalar_lea.vmem %s13_s7, 9600  ;;  %p1156_p4 = scmp.lt.s32.totalorder %s13_s7, %s13_s7 }
   0x8   :  { %p1152_p3 = scmp.ne.s32.totalorder %s13_s7, %s1151_s15  ;;  %p1157_p5 = scmp.lt.s32.totalorder %s1151_s15, %s1151_s15 }
   0xa   :  { %p1158_p6 = por %p1157_p5, %p1156_p4 }
   0xc   :  { %p1159_p7 = pnand %p1158_p6, %p1152_p3 }
   0xe   :  { %1162 = shalt.err (!%p1159_p7)
}
   0xf   :  { %s1166_s16 = smov 128   ;;  %s1167_s17 = smov 8  }
  0x10   :  { %18 = dma.hbm_to_vmem [thread:$0]  %s1230_s0, 9600, %s13_s7, [#allocation3], %s1166_s16, %s1166_s16, %s1167_s17  }
  0x11   :  { %1163 = dma.done.wait [#allocation3], 9600  }
  0x12   :  { %1164 = vsyncadd [#allocation3], 4294957696  ;;  %v35_v0 = vld [vmem:[#allocation2 + $0x40] sm:$0xff]  ;;  %v36_v1 = vld [vmem:[#allocation2 + $0x48] sm:$0xff]  ;;  %vm153_vm0 = vcmask 261120   ;;  %v141_v62 = vlaneseq }
  0x13   :  { %v37_v2 = vld [vmem:[#allocation2 + $0x50] sm:$0xff]  ;;  %v983_v3 = vpack.c.bf16 %v36_v1, %v35_v0  ;;  %v38_v4 = vld [vmem:[#allocation2 + $0x58] sm:$0xff]  ;;  %v39_v6 = vld [vmem:[#allocation2 + $0x60] sm:$0xff] }
  0x14   :  { %v987_v5 = vpack.c.bf16 %v38_v4, %v37_v2  ;;  %v40_v7 = vld [vmem:[#allocation2 + $0x68] sm:$0xff]  ;;  %v31_v9 = vld [vmem:[#allocation2] sm:$0xff]  ;;  %v41_v10 = vld [vmem:[#allocation2 + $0x70] sm:$0xff]  ;;  %v1205_v63 = vshrl.u32 %v141_v62, 7 }
  0x15   :  { %984 = vmatprep.subr.bf16.mxu0 %v983_v3  ;;  %v991_v8 = vpack.c.bf16 %v40_v7, %v39_v6  ;;  %v42_v11 = vld [vmem:[#allocation2 + $0x78] sm:$0xff]  ;;  %838 = vmatprep.mubr.f32.mxu0 %v31_v9  ;;  %v43_v13 = vld [vmem:[#allocation2 + $0x80] sm:$0xff]  ;;  %v44_v14 = vld [vmem:[#allocation2 + $0x88] sm:$0xff] }
  0x16   :  { %986 = vmatpush3.bf16.msra.mxu0 %v983_v3  ;;  %v995_v12 = vpack.c.bf16 %v42_v11, %v41_v10  ;;  %v999_v15 = vpack.c.bf16 %v44_v14, %v43_v13  ;;  %v45_v16 = vld [vmem:[#allocation2 + $0x90] sm:$0xff]  ;;  %v46_v17 = vld [vmem:[#allocation2 + $0x98] sm:$0xff]  ;;  %v47_v19 = vld [vmem:[#allocation2 + $0xa0] sm:$0xff]  ;;  %v1208_v0 = vsub.s32 0, %v1205_v63  ;;  %v147_v3 = vsub.s32 1, %v1205_v63 }
  0x17   :  { %988 = vmatprep.subr.bf16.mxu0 %v987_v5  ;;  %v1003_v18 = vpack.c.bf16 %v46_v17, %v45_v16  ;;  %v48_v20 = vld [vmem:[#allocation2 + $0xa8] sm:$0xff]  ;;  %v49_v22 = vld [vmem:[#allocation2 + $0xb0] sm:$0xff]  ;;  %v50_v23 = vld [vmem:[#allocation2 + $0xb8] sm:$0xff] }
  0x18   :  { %v1007_v21 = vpack.c.bf16 %v48_v20, %v47_v19  ;;  %v1011_v24 = vpack.c.bf16 %v50_v23, %v49_v22  ;;  %v32_v25 = vld [vmem:[#allocation2 + $0x8] sm:$0xff]  ;;  %v33_v26 = vld [vmem:[#allocation2 + $0x10] sm:$0xff]  ;;  %v34_v27 = vld [vmem:[#allocation2 + $0x18] sm:$0xff] }
  0x19   :  { %v136_v28 = vld [vmem:[#allocation2 + $0x20] sm:$0xff]  ;;  %v256_v33 = vld [vmem:[#allocation2 + $0xc8] sm:$0xff]  ;;  %v257_v38 = vld [vmem:[#allocation2 + $0xd0] sm:$0xff] }
  0x1a   :  { %990 = vmatpush3.bf16.msra.mxu0 %v987_v5  ;;  %852 = vmatprep.mubr.msk.f32.mxu1 %vm153_vm0, %v136_v28  ;;  %v255_v32 = vld [vmem:[#allocation2 + $0xc0] sm:$0xff]  ;;  %v258_v39 = vld [vmem:[#allocation2 + $0xd8] sm:$0xff]  ;;  %v1193_v40 = vld [vmem:[#allocation2 + $0x28] sm:$0xff] }
  0x1b   :  { %992 = vmatprep.subr.bf16.mxu0 %v991_v8  ;;  %v1023_v37 = vpack.c.bf16 %v256_v33, %v255_v32  ;;  %v1195_v41 = vld [vmem:[#allocation2 + $0x30] sm:$0xff]  ;;  %v1027_v42 = vpack.c.bf16 %v258_v39, %v257_v38  ;;  %v259_v43 = vld [vmem:[#allocation2 + $0xe0] sm:$0xff]  ;;  %v260_v44 = vld [vmem:[#allocation2 + $0xe8] sm:$0xff] }
  0x1c   :  { %v1201_v45 = vld [vmem:[#allocation2 + $0x38] sm:$0xff]  ;;  %v1031_v46 = vpack.c.bf16 %v260_v44, %v259_v43  ;;  %v261_v47 = vld [vmem:[#allocation2 + $0xf0] sm:$0xff]  ;;  %v263_v50 = vld [vmem:[#allocation2 + $0x100] sm:$0xff] }
  0x1d   :  { %v262_v48 = vld [vmem:[#allocation2 + $0xf8] sm:$0xff]  ;;  %v264_v51 = vld [vmem:[#allocation2 + $0x108] sm:$0xff]  ;;  %v265_v53 = vld [vmem:[#allocation2 + $0x110] sm:$0xff] }
  0x1e   :  { %994 = vmatpush3.bf16.msra.mxu0 %v991_v8  ;;  %v1035_v49 = vpack.c.bf16 %v262_v48, %v261_v47  ;;  %v1039_v52 = vpack.c.bf16 %v264_v51, %v263_v50  ;;  %v266_v54 = vld [vmem:[#allocation2 + $0x118] sm:$0xff]  ;;  %v267_v56 = vld [vmem:[#allocation2 + $0x120] sm:$0xff]  ;;  %v268_v57 = vld [vmem:[#allocation2 + $0x128] sm:$0xff] }
  0x1f   :  { %996 = vmatprep.subr.bf16.mxu0 %v995_v12  ;;  %v1043_v55 = vpack.c.bf16 %v266_v54, %v265_v53  ;;  %v1047_v58 = vpack.c.bf16 %v268_v57, %v267_v56  ;;  %v269_v59 = vld [vmem:[#allocation2 + $0x130] sm:$0xff]  ;;  %v270_v60 = vld [vmem:[#allocation2 + $0x138] sm:$0xff]  ;;  %v140_v1 = vld [vmem:[#allocation2 + $0x240] sm:$0xff] }
  0x20   :  { %v1051_v61 = vpack.c.bf16 %v270_v60, %v269_v59  ;;  %v144_v2 = vrot.slane %v140_v1, %v1208_v0  ;;  %v148_v7 = vrot.slane %v140_v1, %v147_v3  ;;  %v559_v17 = vld [vmem:[#allocation2 + $0x1c0] sm:$0xff]  ;;  %v561_v19 = vld [vmem:[#allocation2 + $0x1d0] sm:$0xff]  ;;  %v570_v33 = vld [vmem:[#allocation2 + $0x218] sm:$0xff] }
  0x21   :  { %v563_v23 = vld [vmem:[#allocation2 + $0x1e0] sm:$0xff]  ;;  %v569_v32 = vld [vmem:[#allocation2 + $0x210] sm:$0xff]  ;;  %v457_v44 = vld [vmem:[#allocation2 + $0x148] sm:$0xff] }
  0x22   :  { %998 = vmatpush3.bf16.msra.mxu0 %v995_v12  ;;  %v456_v43 = vld [vmem:[#allocation2 + $0x140] sm:$0xff]  ;;  %v458_v50 = vld [vmem:[#allocation2 + $0x150] sm:$0xff]  ;;  %v459_v51 = vld [vmem:[#allocation2 + $0x158] sm:$0xff] }
  0x23   :  { %1000 = vmatprep.subr.bf16.mxu0 %v999_v15  ;;  %v460_v53 = vld [vmem:[#allocation2 + $0x160] sm:$0xff]  ;;  %v461_v54 = vld [vmem:[#allocation2 + $0x168] sm:$0xff]  ;;  %v462_v56 = vld [vmem:[#allocation2 + $0x170] sm:$0xff] }
  0x24   :  { %v463_v57 = vld [vmem:[#allocation2 + $0x178] sm:$0xff]  ;;  %v464_v59 = vld [vmem:[#allocation2 + $0x180] sm:$0xff]  ;;  %v465_v60 = vld [vmem:[#allocation2 + $0x188] sm:$0xff] }
  0x25   :  { %v467_v62 = vld [vmem:[#allocation2 + $0x198] sm:$0xff]  ;;  %v573_v1 = vld [vmem:[#allocation2 + $0x230] sm:$0xff] }
  0x26   :  { %1002 = vmatpush3.bf16.msra.mxu0 %v999_v15 }
  0x27   :  { %1004 = vmatprep.subr.bf16.mxu0 %v1003_v18 }
  0x2a   :  { %1006 = vmatpush3.bf16.msra.mxu0 %v1003_v18  ;;  %v560_v18 = vld [vmem:[#allocation2 + $0x1c8] sm:$0xff] }
  0x2b   :  { %1008 = vmatprep.subr.bf16.mxu0 %v1007_v21  ;;  %v1095_v20 = vpack.c.bf16 %v560_v18, %v559_v17 }
  0x2e   :  { %1010 = vmatpush3.bf16.msra.mxu0 %v1007_v21  ;;  %v562_v21 = vld [vmem:[#allocation2 + $0x1d8] sm:$0xff] }
  0x2f   :  { %1012 = vmatprep.subr.bf16.mxu0 %v1011_v24  ;;  %v1099_v22 = vpack.c.bf16 %v562_v21, %v561_v19 }
  0x32   :  { %1014 = vmatpush3.bf16.msra.mxu0 %v1011_v24  ;;  %v564_v24 = vld [vmem:[#allocation2 + $0x1e8] sm:$0xff] }
  0x35   :  { %839 = vmatmul.mubr.f32.vlgmr.msra.gmra.mrb[0].mxu0 %v32_v25  ;;  %v1103_v25 = vpack.c.bf16 %v564_v24, %v563_v23  ;;  %v1168_v23 = vmov 0  }
  0x36   :  { %841 = vmatprep.mubr.f32.mxu0 %v33_v26  ;;  %v565_v26 = vld [vmem:[#allocation2 + $0x1f0] sm:$0xff]  ;;  %1131 = vset.pattern.permute.xlu0 %v1168_v23 }
  0x37   :  { %1132 = vset.pattern.permute.xlu1 %v1168_v23 }
  0x39   :  { %842 = vmatmul.mubr.f32.gmra.mrb[2].mxu0 %v34_v27  ;;  %v566_v27 = vld [vmem:[#allocation2 + $0x1f8] sm:$0xff] }
  0x3a   :  { %904 = vmatprep.mubr.msk.f32.mxu0 %vm153_vm0, %v136_v28  ;;  %v1107_v28 = vpack.c.bf16 %v566_v27, %v565_v26 }
 0x108   :  { %v840_v29 = vpop.f32.mrb[0].mxu0 }
 0x109   :  { %v117_v30 = vpop.f32.mrb[1].mxu0 }
 0x10a   :  { %v1015_v31 = vpack.c.bf16 %v840_v29, %v117_v30  ;;  %v567_v29 = vld [vmem:[#allocation2 + $0x200] sm:$0xff]  ;;  %v568_v30 = vld [vmem:[#allocation2 + $0x208] sm:$0xff] }
 0x10c   :  { %v843_v34 = vpop.f32.mrb[2].mxu0  ;;  %1016 = vmatprep.subr.bf16.mxu1 %v1015_v31 }
 0x10d   :  { %v127_v35 = vpop.f32.mrb[3].mxu0  ;;  %1018 = vmatpush3.bf16.msra.mxu1 %v1015_v31  ;;  %v1111_v31 = vpack.c.bf16 %v568_v30, %v567_v29 }
 0x10e   :  { %v1019_v36 = vpack.c.bf16 %v843_v34, %v127_v35  ;;  %v1115_v34 = vpack.c.bf16 %v570_v33, %v569_v32  ;;  %v571_v35 = vld [vmem:[#allocation2 + $0x220] sm:$0xff] }
 0x110   :  { %1020 = vmatprep.subr.bf16.mxu1 %v1019_v36 }
 0x111   :  { %1022 = vmatpush3.bf16.msra.mxu1 %v1019_v36  ;;  %v572_v36 = vld [vmem:[#allocation2 + $0x228] sm:$0xff] }
 0x112   :  { %1024 = vmatprep.subr.bf16.mxu1 %v1023_v37 }
 0x114   :  { %853 = vmatmul.mubr.msk.f32.vlgmr.msra.gmra.mrb[0].mxu1 %vm153_vm0, %v1193_v40 }
 0x115   :  { %855 = vmatprep.mubr.msk.f32.mxu1 %vm153_vm0, %v1195_v41  ;;  %1026 = vmatpush3.bf16.msra.mxu1 %v1023_v37  ;;  %v1119_v37 = vpack.c.bf16 %v572_v36, %v571_v35 }
 0x116   :  { %1028 = vmatprep.subr.bf16.mxu1 %v1027_v42 }
 0x118   :  { %856 = vmatmul.mubr.msk.f32.gmra.mrb[2].mxu1 %vm153_vm0, %v1201_v45 }
 0x119   :  { %1030 = vmatpush3.bf16.msra.mxu1 %v1027_v42 }
 0x11a   :  { %1032 = vmatprep.subr.bf16.mxu1 %v1031_v46 }
 0x11d   :  { %1034 = vmatpush3.bf16.msra.mxu1 %v1031_v46 }
 0x11e   :  { %1036 = vmatprep.subr.bf16.mxu1 %v1035_v49 }
 0x121   :  { %1038 = vmatpush3.bf16.msra.mxu1 %v1035_v49  ;;  %v1063_v49 = vpack.c.bf16 %v457_v44, %v456_v43 }
 0x122   :  { %1040 = vmatprep.subr.bf16.mxu1 %v1039_v52 }
 0x125   :  { %1042 = vmatpush3.bf16.msra.mxu1 %v1039_v52  ;;  %v1067_v52 = vpack.c.bf16 %v459_v51, %v458_v50 }
 0x126   :  { %1044 = vmatprep.subr.bf16.mxu1 %v1043_v55 }
 0x129   :  { %1046 = vmatpush3.bf16.msra.mxu1 %v1043_v55  ;;  %v1071_v55 = vpack.c.bf16 %v461_v54, %v460_v53 }
 0x12a   :  { %1048 = vmatprep.subr.bf16.mxu1 %v1047_v58 }
 0x12d   :  { %1050 = vmatpush3.bf16.msra.mxu1 %v1047_v58  ;;  %v1075_v58 = vpack.c.bf16 %v463_v57, %v462_v56 }
 0x12e   :  { %1052 = vmatprep.subr.bf16.mxu1 %v1051_v61 }
 0x131   :  { %1054 = vmatpush3.bf16.msra.mxu1 %v1051_v61  ;;  %v1079_v61 = vpack.c.bf16 %v465_v60, %v464_v59 }
 0x132   :  { %1096 = vmatprep.subr.bf16.mxu1 %v1095_v20 }
 0x1e7   :  { %v854_v4 = vpop.f32.mrb[0].mxu1 }
 0x1e8   :  { %v238_v5 = vadd.f32 %v854_v4, %v144_v2  ;;  %v232_v6 = vpop.f32.mrb[1].mxu1 }
 0x1e9   :  { %v233_v8 = vadd.f32 %v232_v6, %v144_v2  ;;  %v574_v2 = vld [vmem:[#allocation2 + $0x238] sm:$0xff] }
 0x1ea   :  { %v252_v11 = vmax.f32 %v238_v5, 0.0  ;;  %v1123_v4 = vpack.c.bf16 %v574_v2, %v573_v1  ;;  %v469_v5 = vld [vmem:[#allocation2 + $0x1a8] sm:$0xff] }
 0x1eb   :  { %v251_v9 = vmax.f32 %v233_v8, 0.0  ;;  %v857_v10 = vpop.f32.mrb[2].mxu1  ;;  %v471_v8 = vld [vmem:[#allocation2 + $0x1b8] sm:$0xff] }
 0x1ec   :  { %v248_v12 = vadd.f32 %v857_v10, %v148_v7  ;;  %v242_v13 = vpop.f32.mrb[3].mxu1  ;;  %v356_v10 = vld [vmem:[#allocation2 + $0x248] sm:$0xff] }
 0x1ed   :  { %v243_v14 = vadd.f32 %v242_v13, %v148_v7  ;;  %890 = vmatprep.mubr.f32.mxu1 %v251_v9  ;;  %v470_v7 = vld [vmem:[#allocation2 + $0x1b0] sm:$0xff] }
 0x1ee   :  { %891 = vmatmul.mubr.f32.vlgmr.msra.gmra.mrb[4].mxu1 %v252_v11  ;;  %v254_v16 = vmax.f32 %v248_v12, 0.0  ;;  %v1091_v9 = vpack.c.bf16 %v471_v8, %v470_v7  ;;  %v360_v11 = vrot.slane %v356_v10, %v1208_v0 }
 0x1ef   :  { %v253_v15 = vmax.f32 %v243_v14, 0.0  ;;  %1098 = vmatpush3.bf16.msra.mxu1 %v1095_v20  ;;  %v364_v14 = vrot.slane %v356_v10, %v147_v3 }
 0x1f0   :  { %1100 = vmatprep.subr.bf16.mxu1 %v1099_v22 }
 0x1f1   :  { %893 = vmatprep.mubr.f32.mxu1 %v253_v15 }
 0x1f2   :  { %894 = vmatmul.mubr.f32.gmra.mrb[6].mxu1 %v254_v16 }
 0x1f3   :  { %1102 = vmatpush3.bf16.msra.mxu1 %v1099_v22 }
 0x1f4   :  { %1104 = vmatprep.subr.bf16.mxu1 %v1103_v25 }
 0x1f7   :  { %1106 = vmatpush3.bf16.msra.mxu1 %v1103_v25 }
 0x1f8   :  { %1108 = vmatprep.subr.bf16.mxu1 %v1107_v28 }
 0x1fb   :  { %1110 = vmatpush3.bf16.msra.mxu1 %v1107_v28 }
 0x1fc   :  { %1112 = vmatprep.subr.bf16.mxu1 %v1111_v31 }
 0x1ff   :  { %1114 = vmatpush3.bf16.msra.mxu1 %v1111_v31 }
 0x200   :  { %1116 = vmatprep.subr.bf16.mxu1 %v1115_v34 }
 0x203   :  { %1118 = vmatpush3.bf16.msra.mxu1 %v1115_v34 }
 0x204   :  { %1120 = vmatprep.subr.bf16.mxu1 %v1119_v37 }
 0x207   :  { %1122 = vmatpush3.bf16.msra.mxu1 %v1119_v37 }
 0x208   :  { %1124 = vmatprep.subr.bf16.mxu1 %v1123_v4 }
 0x20b   :  { %1126 = vmatpush3.bf16.msra.mxu1 %v1123_v4 }
 0x2c1   :  { %v892_v38 = vpop.f32.mrb[4].mxu1 }
 0x2c2   :  { %v337_v39 = vpop.f32.mrb[5].mxu1 }
 0x2c3   :  { %v1055_v42 = vpack.c.bf16 %v892_v38, %v337_v39  ;;  %v660_v39 = vld [vmem:[#allocation2 + $0x250] sm:$0xff] }
 0x2c4   :  { %v692_v44 = vrot.slane %v660_v39, %v1208_v0 }
 0x2c5   :  { %v895_v46 = vpop.f32.mrb[6].mxu1  ;;  %1056 = vmatprep.subr.bf16.mxu0 %v1055_v42 }
 0x2c6   :  { %v347_v47 = vpop.f32.mrb[7].mxu1  ;;  %1058 = vmatpush3.bf16.msra.mxu0 %v1055_v42 }
 0x2c7   :  { %v1059_v48 = vpack.c.bf16 %v895_v46, %v347_v47 }
 0x2c9   :  { %1060 = vmatprep.subr.bf16.mxu0 %v1059_v48 }
 0x2ca   :  { %1062 = vmatpush3.bf16.msra.mxu0 %v1059_v48 }
 0x2cb   :  { %1064 = vmatprep.subr.bf16.mxu0 %v1063_v49 }
 0x2cd   :  { %905 = vmatmul.mubr.msk.f32.vlgmr.msra.gmra.mrb[4].mxu0 %vm153_vm0, %v1193_v40  ;;  %v466_v40 = vld [vmem:[#allocation2 + $0x190] sm:$0xff] }
 0x2ce   :  { %907 = vmatprep.mubr.msk.f32.mxu0 %vm153_vm0, %v1195_v41  ;;  %1066 = vmatpush3.bf16.msra.mxu0 %v1063_v49  ;;  %v1083_v41 = vpack.c.bf16 %v467_v62, %v466_v40 }
 0x2cf   :  { %1068 = vmatprep.subr.bf16.mxu0 %v1067_v52 }
 0x2d1   :  { %908 = vmatmul.mubr.msk.f32.gmra.mrb[6].mxu0 %vm153_vm0, %v1201_v45  ;;  %v468_v45 = vld [vmem:[#allocation2 + $0x1a0] sm:$0xff] }
 0x2d2   :  { %1070 = vmatpush3.bf16.msra.mxu0 %v1067_v52  ;;  %v1087_v6 = vpack.c.bf16 %v469_v5, %v468_v45 }
 0x2d3   :  { %1072 = vmatprep.subr.bf16.mxu0 %v1071_v55 }
 0x2d6   :  { %1074 = vmatpush3.bf16.msra.mxu0 %v1071_v55 }
 0x2d7   :  { %1076 = vmatprep.subr.bf16.mxu0 %v1075_v58 }
 0x2da   :  { %1078 = vmatpush3.bf16.msra.mxu0 %v1075_v58 }
 0x2db   :  { %1080 = vmatprep.subr.bf16.mxu0 %v1079_v61 }
 0x2de   :  { %1082 = vmatpush3.bf16.msra.mxu0 %v1079_v61 }
 0x2df   :  { %1084 = vmatprep.subr.bf16.mxu0 %v1083_v41 }
 0x2e2   :  { %1086 = vmatpush3.bf16.msra.mxu0 %v1083_v41 }
 0x2e3   :  { %1088 = vmatprep.subr.bf16.mxu0 %v1087_v6 }
 0x2e6   :  { %1090 = vmatpush3.bf16.msra.mxu0 %v1087_v6 }
 0x2e7   :  { %1092 = vmatprep.subr.bf16.mxu0 %v1091_v9 }
 0x2ea   :  { %1094 = vmatpush3.bf16.msra.mxu0 %v1091_v9 }
 0x3a0   :  { %v906_v12 = vpop.f32.mrb[4].mxu0 }
 0x3a1   :  { %v435_v13 = vpop.f32.mrb[5].mxu0  ;;  %v441_v16 = vadd.f32 %v906_v12, %v360_v11 }
 0x3a2   :  { %v436_v15 = vadd.f32 %v435_v13, %v360_v11 }
 0x3a4   :  { %v909_v17 = vpop.f32.mrb[6].mxu0  ;;  %977 = vmatprep.mubr.f32.mxu1 %v436_v15 }
 0x3a5   :  { %v451_v18 = vadd.f32 %v909_v17, %v364_v14  ;;  %v445_v19 = vpop.f32.mrb[7].mxu0  ;;  %978 = vmatmul.mubr.f32.vlgmr.msra.gmra.mrb[8].mxu1 %v441_v16 }
 0x3a6   :  { %v446_v20 = vadd.f32 %v445_v19, %v364_v14 }
 0x3a7   :  { %v455_v21 = vadd.f32 %v451_v18, %v441_v16 }
 0x3a8   :  { %v454_v22 = vadd.f32 %v446_v20, %v436_v15  ;;  %980 = vmatprep.mubr.f32.mxu1 %v446_v20 }
 0x3a9   :  { %981 = vmatmul.mubr.f32.gmra.mrb[10].mxu1 %v451_v18 }
 0x3aa   :  { %942 = vmatprep.mubr.f32.mxu0 %v454_v22 }
 0x3ab   :  { %943 = vmatmul.mubr.f32.vlgmr.msra.gmra.mrb[8].mxu0 %v455_v21 }
 0x478   :  { %v979_v24 = vpop.f32.mrb[8].mxu1 }
 0x479   :  { %v641_v63 = vpop.f32.mrb[9].mxu1 }
 0x47c   :  { %v982_v3 = vpop.f32.mrb[10].mxu1 }
 0x47d   :  { %v651_v25 = vpop.f32.mrb[11].mxu1 }
 0x47e   :  { %v944_v26 = vpop.f32.mrb[8].mxu0 }
 0x47f   :  { %v711_v27 = vmul.f32 -1.442695, %v944_v26  ;;  %v538_v28 = vpop.f32.mrb[9].mxu0 }
 0x480   :  { %v710_v29 = vmul.f32 -1.442695, %v538_v28 }
 0x481   :  { %1133 = vpow2.f32 %v711_v27 }
 0x482   :  { %1135 = vpow2.f32 %v710_v29 }
 0x48b   :  { %v1134_v30 = vpop.eup %1133 }
 0x48c   :  { %v1136_v31 = vpop.eup %1135  ;;  %v554_v32 = vadd.f32 1.0, %v1134_v30 }
 0x48d   :  { %v553_v33 = vadd.f32 1.0, %v1136_v31 }
 0x48f   :  { %1137 = vrcp.f32 %v553_v33 }
 0x490   :  { %1139 = vrcp.f32 %v554_v32 }
 0x499   :  { %v1138_v34 = vpop.eup %1137 }
 0x49a   :  { %663 = vperm.xlu0 %1131, %v1138_v34   ;;  %v673_v35 = vsub.f32 1.0, %v1138_v34  ;;  %v1140_v36 = vpop.eup %1139 }
 0x49b   :  { %v674_v37 = vsub.f32 1.0, %v1140_v36 }
 0x49c   :  { %677 = vperm.xlu1 %1132, %v673_v35  }
 0x49e   :  { %668 = vperm.xlu0 %1131, %v1140_v36  }
 0x4a0   :  { %682 = vperm.xlu1 %1132, %v674_v37  }
 0x519   :  { %v664_v38 = vpop.permute.xlu0 %663 }
 0x51a   :  { %v671_v43 = vmul.f32 %v664_v38, %v641_v63 }
 0x51b   :  { %v678_v42 = vpop.permute.xlu1 %677 }
 0x51c   :  { %v685_v46 = vmul.f32 %v678_v42, %v651_v25 }
 0x51d   :  { %v669_v47 = vpop.permute.xlu0 %668 }
 0x51e   :  { %v687_v48 = vadd.f32 %v685_v46, %v671_v43  ;;  %v672_v51 = vmul.f32 %v979_v24, %v669_v47 }
 0x51f   :  { %v683_v49 = vpop.permute.xlu1 %682 }
 0x520   :  { %v693_v50 = vadd.f32 %v692_v44, %v687_v48  ;;  %v686_v52 = vmul.f32 %v982_v3, %v683_v49 }
 0x522   :  { %695 = vst [vmem:[%s1231_s1] sm:$0xff] %v693_v50  ;;  %v688_v53 = vadd.f32 %v686_v52, %v672_v51 }
 0x524   :  { %v694_v54 = vadd.f32 %v692_v44, %v688_v53 }
 0x526   :  { %696 = vst [vmem:[%s1231_s1 + $0x8] sm:$0xff] %v694_v54 }
 0x527   :  { %701 = vsyncpa [#allocation3], 1 }

</bundles_post_ra>
